<compile_context>
chip_gen: v7x
topology: tpu7x:2x2x1
jax: 0.10.0
libtpu: 0.0.40
codegen_flags: <defaults>
</compile_context>

<pallas_src>
import jax
import jax.numpy as jnp
import numpy as np
from jax.experimental import pallas as pl
from jax.experimental.pallas import tpu as pltpu

EPS = 1e-5


# ----------------------------- fused Pallas kernel ------------------------------

def _make_gblock_kernel(h, w):
    """Builds the fused GBlock kernel (closure over static image height/width)."""

    def kernel(x_ref, yc_ref, xc_ref, g1_ref, b1_ref, g2_ref, b2_ref,
               wall_ref, bias_ref, o_ref):
        # x_ref:    [Cin, Ms]      channels on sublanes, flattened (n, y, x) on lanes (f32)
        # yc/xc:    [1, Ms]        per-lane y / x image coordinates (int32)
        # g*/b*:    [Cin, 1]       BN affine params (column vectors -> lane broadcast)
        # wall_ref: [4*Cout, 10*Cin] merged per-parity conv taps + 1x1 shortcut (bf16)
        # bias_ref: [4*Cout, 1]    b_c2 + b_sc (f32)
        # o_ref:    [4*Cout, Ms]   lane-dense output (rows = (py, px, cout))
        x = x_ref[...]
        ms = x.shape[1]
        inv_m = 1.0 / ms

        def bn_relu(t, gamma, beta):
            # training-mode BatchNorm (biased variance, eps=1e-5), single pass over t
            mean = jnp.sum(t, axis=1, keepdims=True) * inv_m
            ex2 = jnp.sum(t * t, axis=1, keepdims=True) * inv_m
            var = ex2 - mean * mean
            scale = gamma * jax.lax.rsqrt(var + EPS)
            return jnp.maximum((t - mean) * scale + beta, 0.0)

        # BN1 -> ReLU -> BN2 -> ReLU, all on the pre-upsample tensor (exact for nearest).
        g = bn_relu(bn_relu(x, g1_ref[...], b1_ref[...]), g2_ref[...], b2_ref[...])

        yy = yc_ref[...]    # [1, Ms] int32
        xx = xc_ref[...]

        # Stacked matmul operand: 9 source-grid shifts of g (zeroed outside the image)
        # followed by x itself (operand of the 1x1 shortcut conv).
        blocks = []
        for ey in (-1, 0, 1):
            for ex in (-1, 0, 1):
                off = ey * w + ex
                # sh[:, i] = g[:, i + off]  (circular; wrapped lanes are masked below)
                sh = g if off == 0 else pltpu.roll(g, (-off) % ms, 1)
                conds = []
                if ey == -1:
                    conds.append(yy >= 1)          # y + ey >= 0
                if ey == 1:
                    conds.append(yy < h - 1)       # y + ey <  H
                if ex == -1:
                    conds.append(xx >= 1)
                if ex == 1:
                    conds.append(xx < w - 1)
                if conds:
                    valid = conds[0]
                    for c in conds[1:]:
                        valid = jnp.logical_and(valid, c)
                    sh = jnp.where(valid, sh, 0.0)
                blocks.append(sh)
        blocks.append(x)                                        # shortcut operand
        s = jnp.concatenate(blocks, axis=0).astype(jnp.bfloat16)  # [10*Cin, Ms]

        # conv3x3 (all 4 output parities) + 1x1 shortcut + both biases: one MXU matmul.
        acc = jnp.dot(wall_ref[...], s, preferred_element_type=jnp.float32)
        o_ref[...] = acc + bias_ref[...]

    return kernel


# ----------------------------- GBlock forward ------------------------------

def gblock_forward(x_nchw, concat_vector, params):
    del concat_vector  # concat_vector_dim is None -> unused (matches reference forward)
    x = x_nchw.astype(jnp.float32)
    N, Cin, H, W = x.shape
    Ms = N * H * W
    Cout, Chid = params["w_c2"].shape[0], params["w_c2"].shape[1]
    assert Chid == Cin, "forward() skips c1, so hidden_channels must equal in_channels"

    # channels on sublanes, flattened (n, y, x) on lanes (layout plumbing only)
    x_cm = jnp.transpose(x, (1, 0, 2, 3)).reshape(Cin, Ms)

    # Per-lane (y, x) coordinates for the in-kernel boundary masks.  Shape-only, so
    # plain numpy; 2 * Ms int32 = 1 KiB (vs the old [9, 1, Mu] f32 mask tensor).
    lane = np.arange(Ms)
    ycoord = ((lane // W) % H).astype(np.int32).reshape(1, Ms)
    xcoord = (lane % W).astype(np.int32).reshape(1, Ms)

    # Merged weights: for output rows Y = 2y + py, a 3x3 tap at dy reads upsampled row
    # Y + dy, i.e. source row y + (py + dy)//2; same for columns.  Collapse the 3x3 conv
    # into per-parity 2x2 (stored over the 9 source offsets) weights and append the 1x1
    # shortcut weight as a 10th block.  All 4 parities are stacked on the row axis so the
    # whole block is ONE matmul.
    w = params["w_c2"].astype(jnp.float32)                    # [Cout, Cin, 3, 3]
    w_sc = params["w_sc"][:, :, 0, 0].astype(jnp.float32)     # [Cout, Cin]
    rows = []
    for py in range(2):
        for px in range(2):
            taps = []
            for ey in (-1, 0, 1):
                for ex in (-1, 0, 1):
                    wk = jnp.zeros((Cout, Cin), jnp.float32)
                    for dy in (-1, 0, 1):
                        for dx in (-1, 0, 1):
                            if (py + dy) // 2 == ey and (px + dx) // 2 == ex:
                                wk = wk + w[:, :, dy + 1, dx + 1]
                    taps.append(wk)
            taps.append(w_sc)
            rows.append(jnp.concatenate(taps, axis=1))            # [Cout, 10*Cin]
    w_all = jnp.concatenate(rows, axis=0).astype(jnp.bfloat16)    # [4*Cout, 10*Cin]
    bias = jnp.tile((params["b_c2"] + params["b_sc"]).reshape(Cout, 1), (4, 1))

    out = pl.pallas_call(
        _make_gblock_kernel(H, W),
        out_shape=jax.ShapeDtypeStruct((4 * Cout, Ms), jnp.float32),
    )(x_cm, jnp.asarray(ycoord), jnp.asarray(xcoord),
      params["g1"].reshape(Cin, 1), params["be1"].reshape(Cin, 1),
      params["g2"].reshape(Cin, 1), params["be2"].reshape(Cin, 1),
      w_all, bias)

    # parity interleave back to PyTorch NCHW: rows are (py, px, cout); cols are (n, y, x)
    out = out.reshape(2, 2, Cout, N, H, W)
    out = jnp.transpose(out, (3, 2, 4, 0, 5, 1)).reshape(N, Cout, 2 * H, 2 * W)
    return out


# ----------------------------- plain-JAX reference ------------------------------

def _ref_forward(x, params):
    def bn(t, g, b):
        mean = t.mean(axis=(0, 2, 3), keepdims=True)
        var = ((t - mean) ** 2).mean(axis=(0, 2, 3), keepdims=True)
        return ((t - mean) / jnp.sqrt(var + EPS) * g[None, :, None, None]
                + b[None, :, None, None])

    def up(t):
        return jnp.repeat(jnp.repeat(t, 2, axis=2), 2, axis=3)

    def conv(t, w, b, pad):
        y = jax.lax.conv_general_dilated(
            t, w, (1, 1), [(pad, pad), (pad, pad)],
            dimension_numbers=("NCHW", "OIHW", "NCHW"),
            precision=jax.lax.Precision.HIGHEST)
        return y + b[None, :, None, None]

    x0 = conv(up(x), params["w_sc"], params["b_sc"], 0)
    h = jnp.maximum(bn(x, params["g1"], params["be1"]), 0.0)
    h = up(h)
    h = jnp.maximum(bn(h, params["g2"], params["be2"]), 0.0)
    h = conv(h, params["w_c2"], params["b_c2"], 1)
    return h + x0


# ----------------------------- main ------------------------------

if __name__ == "__main__":
    key = jax.random.PRNGKey(0)
    N, Cin, H, W = 2, 8, 8, 8
    Chid, Cout = 8, 16    # hidden_channels == in_channels (required by the given forward)
    ks = jax.random.split(key, 10)

    x = jax.random.normal(ks[0], (N, Cin, H, W), jnp.float32)
    concat_vector = jax.random.normal(ks[1], (N, 32), jnp.float32)  # ignored (dim=None)

    params = {
        # c2: Conv2d(hidden, out, 3, 1, 1)
        "w_c2": 0.1 * jax.random.normal(ks[2], (Cout, Chid, 3, 3), jnp.float32),
        "b_c2": 0.1 * jax.random.normal(ks[3], (Cout,), jnp.float32),
        # c_sc: Conv2d(in, out, 1, 1, 0)   (learnable_sc because upsample=True)
        "w_sc": 0.1 * jax.random.normal(ks[4], (Cout, Cin, 1, 1), jnp.float32),
        "b_sc": 0.1 * jax.random.normal(ks[5], (Cout,), jnp.float32),
        # b1, b2: BatchNorm2d affine params
        "g1": 1.0 + 0.1 * jax.random.normal(ks[6], (Cin,), jnp.float32),
        "be1": 0.1 * jax.random.normal(ks[7], (Cin,), jnp.float32),
        "g2": 1.0 + 0.1 * jax.random.normal(ks[8], (Chid,), jnp.float32),
        "be2": 0.1 * jax.random.normal(ks[9], (Chid,), jnp.float32),
    }

    out = jax.block_until_ready(gblock_forward(x, concat_vector, params))
    ref = jax.block_until_ready(_ref_forward(x, params))

    assert out.shape == (N, Cout, 2 * H, 2 * W), out.shape
    np.testing.assert_allclose(np.asarray(out), np.asarray(ref), rtol=2e-2, atol=2e-2)
    print("KERNEL_OK")
</pallas_src>

<mosaic_0001>
module attributes {stable_mosaic.version = 11 : i64} {
  func.func @kernel(%arg0: memref<8x128xf32, #tpu.memory_space<vmem>>, %arg1: memref<1x128xi32, #tpu.memory_space<vmem>>, %arg2: memref<1x128xi32, #tpu.memory_space<vmem>>, %arg3: memref<8x1xf32, #tpu.memory_space<vmem>>, %arg4: memref<8x1xf32, #tpu.memory_space<vmem>>, %arg5: memref<8x1xf32, #tpu.memory_space<vmem>>, %arg6: memref<8x1xf32, #tpu.memory_space<vmem>>, %arg7: memref<64x80xbf16, #tpu.memory_space<vmem>>, %arg8: memref<64x1xf32, #tpu.memory_space<vmem>>, %arg9: memref<64x128xf32, #tpu.memory_space<vmem>>) attributes {dimension_semantics = [], scalar_prefetch = 0 : i64, scratch_operands = 0 : i64, tpu.core_type = #tpu.core_type<tc>} {
    %c0 = arith.constant 0 : index
    %c0_0 = arith.constant 0 : index
    %0 = vector.load %arg0[%c0, %c0_0] : memref<8x128xf32, #tpu.memory_space<vmem>>, vector<8x128xf32>
    %c0_1 = arith.constant 0 : index
    %c0_2 = arith.constant 0 : index
    %1 = vector.load %arg3[%c0_1, %c0_2] : memref<8x1xf32, #tpu.memory_space<vmem>>, vector<8x1xf32>
    %c0_3 = arith.constant 0 : index
    %c0_4 = arith.constant 0 : index
    %2 = vector.load %arg4[%c0_3, %c0_4] : memref<8x1xf32, #tpu.memory_space<vmem>>, vector<8x1xf32>
    %cst = arith.constant dense<0.000000e+00> : vector<8xf32>
    %3 = vector.multi_reduction <add>, %0, %cst [1] : vector<8x128xf32> to vector<8xf32>
    %4 = vector.shape_cast %3 : vector<8xf32> to vector<8x1xf32>
    %cst_5 = arith.constant 7.812500e-03 : f32
    %5 = vector.broadcast %cst_5 : f32 to vector<8x1xf32>
    %6 = arith.mulf %4, %5 : vector<8x1xf32>
    %7 = arith.mulf %0, %0 : vector<8x128xf32>
    %cst_6 = arith.constant dense<0.000000e+00> : vector<8xf32>
    %8 = vector.multi_reduction <add>, %7, %cst_6 [1] : vector<8x128xf32> to vector<8xf32>
    %9 = vector.shape_cast %8 : vector<8xf32> to vector<8x1xf32>
    %cst_7 = arith.constant 7.812500e-03 : f32
    %10 = vector.broadcast %cst_7 : f32 to vector<8x1xf32>
    %11 = arith.mulf %9, %10 : vector<8x1xf32>
    %12 = arith.mulf %6, %6 : vector<8x1xf32>
    %13 = arith.subf %11, %12 : vector<8x1xf32>
    %cst_8 = arith.constant 9.99999974E-6 : f32
    %14 = vector.broadcast %cst_8 : f32 to vector<8x1xf32>
    %15 = arith.addf %13, %14 : vector<8x1xf32>
    %16 = math.rsqrt %15 : vector<8x1xf32>
    %17 = arith.mulf %1, %16 : vector<8x1xf32>
    %18 = vector.broadcast %6 : vector<8x1xf32> to vector<8x128xf32>
    %19 = arith.subf %0, %18 : vector<8x128xf32>
    %20 = vector.broadcast %17 : vector<8x1xf32> to vector<8x128xf32>
    %21 = arith.mulf %19, %20 : vector<8x128xf32>
    %22 = vector.broadcast %2 : vector<8x1xf32> to vector<8x128xf32>
    %23 = arith.addf %21, %22 : vector<8x128xf32>
    %cst_9 = arith.constant 0.000000e+00 : f32
    %24 = vector.broadcast %cst_9 : f32 to vector<8x128xf32>
    %25 = arith.maximumf %23, %24 : vector<8x128xf32>
    %c0_10 = arith.constant 0 : index
    %c0_11 = arith.constant 0 : index
    %26 = vector.load %arg5[%c0_10, %c0_11] : memref<8x1xf32, #tpu.memory_space<vmem>>, vector<8x1xf32>
    %c0_12 = arith.constant 0 : index
    %c0_13 = arith.constant 0 : index
    %27 = vector.load %arg6[%c0_12, %c0_13] : memref<8x1xf32, #tpu.memory_space<vmem>>, vector<8x1xf32>
    %cst_14 = arith.constant dense<0.000000e+00> : vector<8xf32>
    %28 = vector.multi_reduction <add>, %25, %cst_14 [1] : vector<8x128xf32> to vector<8xf32>
    %29 = vector.shape_cast %28 : vector<8xf32> to vector<8x1xf32>
    %cst_15 = arith.constant 7.812500e-03 : f32
    %30 = vector.broadcast %cst_15 : f32 to vector<8x1xf32>
    %31 = arith.mulf %29, %30 : vector<8x1xf32>
    %32 = arith.mulf %25, %25 : vector<8x128xf32>
    %cst_16 = arith.constant dense<0.000000e+00> : vector<8xf32>
    %33 = vector.multi_reduction <add>, %32, %cst_16 [1] : vector<8x128xf32> to vector<8xf32>
    %34 = vector.shape_cast %33 : vector<8xf32> to vector<8x1xf32>
    %cst_17 = arith.constant 7.812500e-03 : f32
    %35 = vector.broadcast %cst_17 : f32 to vector<8x1xf32>
    %36 = arith.mulf %34, %35 : vector<8x1xf32>
    %37 = arith.mulf %31, %31 : vector<8x1xf32>
    %38 = arith.subf %36, %37 : vector<8x1xf32>
    %cst_18 = arith.constant 9.99999974E-6 : f32
    %39 = vector.broadcast %cst_18 : f32 to vector<8x1xf32>
    %40 = arith.addf %38, %39 : vector<8x1xf32>
    %41 = math.rsqrt %40 : vector<8x1xf32>
    %42 = arith.mulf %26, %41 : vector<8x1xf32>
    %43 = vector.broadcast %31 : vector<8x1xf32> to vector<8x128xf32>
    %44 = arith.subf %25, %43 : vector<8x128xf32>
    %45 = vector.broadcast %42 : vector<8x1xf32> to vector<8x128xf32>
    %46 = arith.mulf %44, %45 : vector<8x128xf32>
    %47 = vector.broadcast %27 : vector<8x1xf32> to vector<8x128xf32>
    %48 = arith.addf %46, %47 : vector<8x128xf32>
    %cst_19 = arith.constant 0.000000e+00 : f32
    %49 = vector.broadcast %cst_19 : f32 to vector<8x128xf32>
    %50 = arith.maximumf %48, %49 : vector<8x128xf32>
    %c0_20 = arith.constant 0 : index
    %c0_21 = arith.constant 0 : index
    %51 = vector.load %arg1[%c0_20, %c0_21] : memref<1x128xi32, #tpu.memory_space<vmem>>, vector<1x128xi32>
    %c0_22 = arith.constant 0 : index
    %c0_23 = arith.constant 0 : index
    %52 = vector.load %arg2[%c0_22, %c0_23] : memref<1x128xi32, #tpu.memory_space<vmem>>, vector<1x128xi32>
    %c9_i32 = arith.constant 9 : i32
    %53 = tpu.dynamic_rotate %50 by %c9_i32 dim 1 : vector<8x128xf32>, i32 -> vector<8x128xf32>
    %c1_i32 = arith.constant 1 : i32
    %54 = vector.broadcast %c1_i32 : i32 to vector<1x128xi32>
    %55 = arith.cmpi sge, %51, %54 : vector<1x128xi32>
    %c1_i32_24 = arith.constant 1 : i32
    %56 = vector.broadcast %c1_i32_24 : i32 to vector<1x128xi32>
    %57 = arith.cmpi sge, %52, %56 : vector<1x128xi32>
    %58 = arith.andi %55, %57 : vector<1x128xi1>
    %cst_25 = arith.constant 0.000000e+00 : f32
    %59 = vector.shape_cast %58 : vector<1x128xi1> to vector<1x128xi1>
    %60 = vector.broadcast %59 : vector<1x128xi1> to vector<8x128xi1>
    %61 = vector.broadcast %cst_25 : f32 to vector<8x128xf32>
    %62 = arith.select %60, %53, %61 : vector<8x128xi1>, vector<8x128xf32>
    %c8_i32 = arith.constant 8 : i32
    %63 = tpu.dynamic_rotate %50 by %c8_i32 dim 1 : vector<8x128xf32>, i32 -> vector<8x128xf32>
    %c1_i32_26 = arith.constant 1 : i32
    %64 = vector.broadcast %c1_i32_26 : i32 to vector<1x128xi32>
    %65 = arith.cmpi sge, %51, %64 : vector<1x128xi32>
    %cst_27 = arith.constant 0.000000e+00 : f32
    %66 = vector.shape_cast %65 : vector<1x128xi1> to vector<1x128xi1>
    %67 = vector.broadcast %66 : vector<1x128xi1> to vector<8x128xi1>
    %68 = vector.broadcast %cst_27 : f32 to vector<8x128xf32>
    %69 = arith.select %67, %63, %68 : vector<8x128xi1>, vector<8x128xf32>
    %c7_i32 = arith.constant 7 : i32
    %70 = tpu.dynamic_rotate %50 by %c7_i32 dim 1 : vector<8x128xf32>, i32 -> vector<8x128xf32>
    %c1_i32_28 = arith.constant 1 : i32
    %71 = vector.broadcast %c1_i32_28 : i32 to vector<1x128xi32>
    %72 = arith.cmpi sge, %51, %71 : vector<1x128xi32>
    %c7_i32_29 = arith.constant 7 : i32
    %73 = vector.broadcast %c7_i32_29 : i32 to vector<1x128xi32>
    %74 = arith.cmpi slt, %52, %73 : vector<1x128xi32>
    %75 = arith.andi %72, %74 : vector<1x128xi1>
    %cst_30 = arith.constant 0.000000e+00 : f32
    %76 = vector.shape_cast %75 : vector<1x128xi1> to vector<1x128xi1>
    %77 = vector.broadcast %76 : vector<1x128xi1> to vector<8x128xi1>
    %78 = vector.broadcast %cst_30 : f32 to vector<8x128xf32>
    %79 = arith.select %77, %70, %78 : vector<8x128xi1>, vector<8x128xf32>
    %c1_i32_31 = arith.constant 1 : i32
    %80 = tpu.dynamic_rotate %50 by %c1_i32_31 dim 1 : vector<8x128xf32>, i32 -> vector<8x128xf32>
    %c1_i32_32 = arith.constant 1 : i32
    %81 = vector.broadcast %c1_i32_32 : i32 to vector<1x128xi32>
    %82 = arith.cmpi sge, %52, %81 : vector<1x128xi32>
    %cst_33 = arith.constant 0.000000e+00 : f32
    %83 = vector.shape_cast %82 : vector<1x128xi1> to vector<1x128xi1>
    %84 = vector.broadcast %83 : vector<1x128xi1> to vector<8x128xi1>
    %85 = vector.broadcast %cst_33 : f32 to vector<8x128xf32>
    %86 = arith.select %84, %80, %85 : vector<8x128xi1>, vector<8x128xf32>
    %c127_i32 = arith.constant 127 : i32
    %87 = tpu.dynamic_rotate %50 by %c127_i32 dim 1 : vector<8x128xf32>, i32 -> vector<8x128xf32>
    %c7_i32_34 = arith.constant 7 : i32
    %88 = vector.broadcast %c7_i32_34 : i32 to vector<1x128xi32>
    %89 = arith.cmpi slt, %52, %88 : vector<1x128xi32>
    %cst_35 = arith.constant 0.000000e+00 : f32
    %90 = vector.shape_cast %89 : vector<1x128xi1> to vector<1x128xi1>
    %91 = vector.broadcast %90 : vector<1x128xi1> to vector<8x128xi1>
    %92 = vector.broadcast %cst_35 : f32 to vector<8x128xf32>
    %93 = arith.select %91, %87, %92 : vector<8x128xi1>, vector<8x128xf32>
    %c121_i32 = arith.constant 121 : i32
    %94 = tpu.dynamic_rotate %50 by %c121_i32 dim 1 : vector<8x128xf32>, i32 -> vector<8x128xf32>
    %c7_i32_36 = arith.constant 7 : i32
    %95 = vector.broadcast %c7_i32_36 : i32 to vector<1x128xi32>
    %96 = arith.cmpi slt, %51, %95 : vector<1x128xi32>
    %c1_i32_37 = arith.constant 1 : i32
    %97 = vector.broadcast %c1_i32_37 : i32 to vector<1x128xi32>
    %98 = arith.cmpi sge, %52, %97 : vector<1x128xi32>
    %99 = arith.andi %96, %98 : vector<1x128xi1>
    %cst_38 = arith.constant 0.000000e+00 : f32
    %100 = vector.shape_cast %99 : vector<1x128xi1> to vector<1x128xi1>
    %101 = vector.broadcast %100 : vector<1x128xi1> to vector<8x128xi1>
    %102 = vector.broadcast %cst_38 : f32 to vector<8x128xf32>
    %103 = arith.select %101, %94, %102 : vector<8x128xi1>, vector<8x128xf32>
    %c120_i32 = arith.constant 120 : i32
    %104 = tpu.dynamic_rotate %50 by %c120_i32 dim 1 : vector<8x128xf32>, i32 -> vector<8x128xf32>
    %c7_i32_39 = arith.constant 7 : i32
    %105 = vector.broadcast %c7_i32_39 : i32 to vector<1x128xi32>
    %106 = arith.cmpi slt, %51, %105 : vector<1x128xi32>
    %cst_40 = arith.constant 0.000000e+00 : f32
    %107 = vector.shape_cast %106 : vector<1x128xi1> to vector<1x128xi1>
    %108 = vector.broadcast %107 : vector<1x128xi1> to vector<8x128xi1>
    %109 = vector.broadcast %cst_40 : f32 to vector<8x128xf32>
    %110 = arith.select %108, %104, %109 : vector<8x128xi1>, vector<8x128xf32>
    %c119_i32 = arith.constant 119 : i32
    %111 = tpu.dynamic_rotate %50 by %c119_i32 dim 1 : vector<8x128xf32>, i32 -> vector<8x128xf32>
    %c7_i32_41 = arith.constant 7 : i32
    %112 = vector.broadcast %c7_i32_41 : i32 to vector<1x128xi32>
    %113 = arith.cmpi slt, %51, %112 : vector<1x128xi32>
    %c7_i32_42 = arith.constant 7 : i32
    %114 = vector.broadcast %c7_i32_42 : i32 to vector<1x128xi32>
    %115 = arith.cmpi slt, %52, %114 : vector<1x128xi32>
    %116 = arith.andi %113, %115 : vector<1x128xi1>
    %cst_43 = arith.constant 0.000000e+00 : f32
    %117 = vector.shape_cast %116 : vector<1x128xi1> to vector<1x128xi1>
    %118 = vector.broadcast %117 : vector<1x128xi1> to vector<8x128xi1>
    %119 = vector.broadcast %cst_43 : f32 to vector<8x128xf32>
    %120 = arith.select %118, %111, %119 : vector<8x128xi1>, vector<8x128xf32>
    %121 = tpu.concatenate %62, %69, %79, %86, %50, %93, %103, %110, %120, %0 in 0 : vector<8x128xf32>, vector<8x128xf32>, vector<8x128xf32>, vector<8x128xf32>, vector<8x128xf32>, vector<8x128xf32>, vector<8x128xf32>, vector<8x128xf32>, vector<8x128xf32>, vector<8x128xf32> -> vector<80x128xf32>
    %122 = arith.truncf %121 : vector<80x128xf32> to vector<80x128xbf16>
    %c0_44 = arith.constant 0 : index
    %c0_45 = arith.constant 0 : index
    %123 = vector.load %arg7[%c0_44, %c0_45] : memref<64x80xbf16, #tpu.memory_space<vmem>>, vector<64x80xbf16>
    %cst_46 = arith.constant dense<0.000000e+00> : vector<64x128xf32>
    %124 = tpu.matmul %123, %122, %cst_46 {dimension_numbers = #tpu.dot_dimension_numbers<[1], [0], [0], [1], [0, 0, 1, 1], [], []>} : vector<64x80xbf16>, vector<80x128xbf16>, vector<64x128xf32> -> vector<64x128xf32>
    %c0_47 = arith.constant 0 : index
    %c0_48 = arith.constant 0 : index
    %125 = vector.load %arg8[%c0_47, %c0_48] : memref<64x1xf32, #tpu.memory_space<vmem>>, vector<64x1xf32>
    %126 = vector.broadcast %125 : vector<64x1xf32> to vector<64x128xf32>
    %127 = arith.addf %124, %126 : vector<64x128xf32>
    %c0_49 = arith.constant 0 : index
    %c0_50 = arith.constant 0 : index
    %128 = vector.load %arg9[%c0_49, %c0_50] : memref<64x128xf32, #tpu.memory_space<vmem>>, vector<64x128xf32>
    tpu.vector_store %arg9[%c0_49, %c0_50], %127 {strides = array<i32>} : memref<64x128xf32, #tpu.memory_space<vmem>>, vector<64x128xf32>,
    return
  }
}

</mosaic_0001>

<bundles_post_ra>
// kernel: tpu_custom_call.1
= control target key start
LH: loop header
LB: loop body
LE: loop exit
PB: predicated region body
PF: predicated region fallthrough
CT: control target
= control target key end

     0   :  { %s650_s0 = inlined_call_operand.vmem [shape: f32[8,128], index: 0, kind: input, shape index: {}]   ;;  %s651_s1 = inlined_call_operand.vmem [shape: s32[1,128], index: 1, kind: input, shape index: {}]   ;;  %s652_s2 = inlined_call_operand.vmem [shape: s32[1,128], index: 2, kind: input, shape index: {}]   ;;  %s653_s3 = inlined_call_operand.vmem [shape: f32[8,1], index: 3, kind: input, shape index: {}]   ;;  %s654_s4 = inlined_call_operand.vmem [shape: f32[8,1], index: 4, kind: input, shape index: {}]   ;;  %s655_s5 = inlined_call_operand.vmem [shape: f32[8,1], index: 5, kind: input, shape index: {}]   ;;  %s656_s6 = inlined_call_operand.vmem [shape: f32[8,1], index: 6, kind: input, shape index: {}]   ;;  %s657_s7 = inlined_call_operand.vmem [shape: bf16[64,80], index: 7, kind: input, shape index: {}]   ;;  %s658_s8 = inlined_call_operand.vmem [shape: f32[64,1], index: 8, kind: input, shape index: {}]   ;;  %s659_s9 = inlined_call_operand.hbm [shape: f32[64,128], index: 9, kind: output, shape index: {}]  }
   0x1   :  { %v527_v0 = vld [vmem:[%s650_s0] sm:$0xff] }
   0x2   :  { %37 = vadd.xlane.f32.xlu0 %v527_v0  ;;  %v40_v1 = vmul.f32 %v527_v0, %v527_v0 }
   0x3   :  { %14 = vsyncpa [#allocation3], 0  ;;  %v462_v2 = vmov 0   ;;  %v35_v10 = vld [vmem:[%s653_s3] sm:$0xff]  ;;  %s464_s16 = smov 9   ;;  %s465_s17 = smov 127   ;;  %v99_v50 = vlaneseq }
   0x4   :  { %428 = vset.pattern.permute.xlu1 %v462_v2  ;;  %429 = vset.pattern.permute.xlu0 %v462_v2  ;;  %v36_v13 = vld [vmem:[%s654_s4] sm:$0xff]  ;;  %s467_s18 = smov 120   ;;  %s468_s19 = smov 1   ;;  %v431_v40 = vld [vmem:[%s657_s7 + $0x10] sm:$0xff]   ;;  %vm254_vm0 = vcmask 654336   ;;  %v187_v43 = vld [vmem:[%s658_s8 + $0x8] sm:$0xff] }
   0x5   :  { %v64_v21 = vld [vmem:[%s656_s6] sm:$0xff]  ;;  %s463_s6 = smov 7   ;;  %s469_s26 = smov 121   ;;  %v188_v41 = vld [vmem:[%s658_s8 + $0x10] sm:$0xff]  ;;  %402 = vmatprep.mubr.msk.bf16.mxu1 %vm254_vm0, %v431_v40  ;;  %v189_v45 = vld [vmem:[%s658_s8 + $0x18] sm:$0xff]  ;;  %v100_v51 = vshrl.u32 %v99_v50, 7 }
   0x6   :  { %41 = vadd.xlane.f32.xlu0 %v40_v1  ;;  %v63_v29 = vld [vmem:[%s655_s5] sm:$0xff]  ;;  %s466_s5 = smov 8   ;;  %s470_s29 = smov 119   ;;  %v192_v44 = vld [vmem:[%s658_s8 + $0x30] sm:$0xff]  ;;  %v191_v46 = vld [vmem:[%s658_s8 + $0x28] sm:$0xff] }
   0x7   :  { %v186_v38 = vld [vmem:[%s658_s8] sm:$0xff]  ;;  %v193_v47 = vld [vmem:[%s658_s8 + $0x38] sm:$0xff]  ;;  %v101_v52 = vsub.s32 0, %v100_v51 }
   0x8   :  { %v430_v39 = vld [vmem:[%s657_s7] sm:$0xff]  }
   0x9   :  { %398 = vmatprep.mubr.msk.bf16.mxu0 %vm254_vm0, %v430_v39  ;;  %v190_v42 = vld [vmem:[%s658_s8 + $0x20] sm:$0xff] }
   0xa   :  { %v91_v48 = vld [vmem:[%s651_s1] sm:$0x1] }
   0xb   :  { %v92_v49 = vld [vmem:[%s652_s2] sm:$0x1]  ;;  %vm95_vm1 = vcmp.ge.s32.totalorder %v91_v48, 1  ;;  %vm145_vm6 = vcmp.lt.s32.totalorder %v91_v48, 7 }
   0xc   :  { %vm96_vm2 = vcmp.ge.s32.totalorder %v92_v49, 1  ;;  %vm116_vm4 = vcmp.lt.s32.totalorder %v92_v49, 7  ;;  %v107_v54 = vsel %vm95_vm1, 1, %v462_v2 }
   0xd   :  { %vm97_vm3 = vmand %vm95_vm1, %vm96_vm2  ;;  %v111_v56 = vrot.slane %v107_v54, %v101_v52  ;;  %v127_v58 = vsel %vm96_vm2, 1, %v462_v2  ;;  %v136_v60 = vsel %vm116_vm4, 1, %v462_v2 }
   0xe   :  { %v98_v53 = vsel %vm97_vm3, 1, %v462_v2  ;;  %vm117_vm5 = vmand %vm95_vm1, %vm116_vm4  ;;  %v131_v62 = vrot.slane %v127_v58, %v101_v52  ;;  %v140_v1 = vrot.slane %v136_v60, %v101_v52  ;;  %vm471_vm1 = vmmov 1  }
   0xf   :  { %v102_v55 = vrot.slane %v98_v53, %v101_v52  ;;  %v118_v57 = vsel %vm117_vm5, 1, %v462_v2  ;;  %vm112_vm8 = vcmp.eq.s32.totalorder %v111_v56, 1  ;;  %vm146_vm9 = vmand %vm145_vm6, %vm96_vm2 }
  0x10   :  { %v122_v61 = vrot.slane %v118_v57, %v101_v52  ;;  %vm132_vm12 = vcmp.eq.s32.totalorder %v131_v62, 1  ;;  %vm165_vm13 = vmand %vm145_vm6, %vm116_vm4  ;;  %vm141_vm14 = vcmp.eq.s32.totalorder %v140_v1, 1 }
  0x11   :  { %vm103_vm7 = vcmp.eq.s32.totalorder %v102_v55, 1  ;;  %vm614_vm2 = vmpackc.low %vm141_vm14, %vm471_vm1 }
  0x12   :  { %vm360_vm10 = vmpackc.low %vm112_vm8, %vm103_vm7  ;;  %vm123_vm11 = vcmp.eq.s32.totalorder %v122_v61, 1 }
  0x13   :  { %vm363_vm15 = vmpackc.low %vm132_vm12, %vm123_vm11 }
  0x8f   :  { %v38_v3 = vpop.xlane.xlu0 %37 }
  0x90   :  { %v39_v4 = vmul.f32 0.0078125, %v38_v3 }
  0x92   :  { %v44_v6 = vmul.f32 %v39_v4, %v39_v4  ;;  %v49_v15 = vsub.f32 %v527_v0, %v39_v4  ;;  %v147_v4 = vsel %vm146_vm9, 1, %v462_v2 }
  0x93   :  { %v42_v5 = vpop.xlane.xlu0 %41 }
  0x94   :  { %v43_v7 = vmul.f32 0.0078125, %v42_v5  ;;  %v156_v5 = vsel %vm145_vm6, 1, %v462_v2 }
  0x96   :  { %v45_v8 = vsub.f32 %v43_v7, %v44_v6  ;;  %v151_v7 = vrot.slane %v147_v4, %v101_v52 }
  0x98   :  { %v46_v9 = vadd.f32 1e-05, %v45_v8  ;;  %v160_v8 = vrot.slane %v156_v5, %v101_v52  ;;  %vm152_vm3 = vcmp.eq.s32.totalorder %v151_v7, 1 }
  0x9a   :  { %434 = vrsqrt.f32 %v46_v9  ;;  %vm161_vm4 = vcmp.eq.s32.totalorder %v160_v8, 1 }
  0x9b   :  { %vm369_vm5 = vmpackc.low %vm161_vm4, %vm152_vm3 }
  0xa4   :  { %v435_v11 = vpop.eup %434 }
  0xa5   :  { %v48_v12 = vmul.f32 %v435_v11, %v35_v10  ;;  %v166_v11 = vsel %vm165_vm13, 1, %v462_v2 }
  0xa7   :  { %52 = vperm.xlu1 %428, %v48_v12  }
  0xab   :  { %58 = vperm.xlu1 %428, %v36_v13  }
 0x126   :  { %v53_v14 = vpop.permute.xlu1 %52 }
 0x127   :  { %v55_v16 = vmul.f32 %v53_v14, %v49_v15  ;;  %v170_v15 = vrot.slane %v166_v11, %v101_v52 }
 0x129   :  { %vm171_vm6 = vcmp.eq.s32.totalorder %v170_v15, 1 }
 0x12a   :  { %v59_v17 = vpop.permute.xlu1 %58  ;;  %vm372_vm7 = vmpackc.low %vm471_vm1, %vm171_vm6 }
 0x12b   :  { %v61_v18 = vadd.f32 %v59_v17, %v55_v16 }
 0x12d   :  { %v62_v19 = vmax.f32 %v61_v18, 0.0 }
 0x12f   :  { %65 = vadd.xlane.f32.xlu0 %v62_v19  ;;  %v68_v20 = vmul.f32 %v62_v19, %v62_v19 }
 0x131   :  { %69 = vadd.xlane.f32.xlu1 %v68_v20  ;;  %v432_v20 = vld [vmem:[%s657_s7 + $0x8] sm:$0xff]  }
 0x142   :  { %86 = vperm.xlu1 %428, %v64_v21   ;;  %v433_v21 = vld [vmem:[%s657_s7 + $0x18] sm:$0xff]   ;;  %s472_s7 = smov [#allocation2]  }
 0x143   :  { %s345_s22 = sshll.u32 %s472_s7, 4  ;;  %s346_s22 = int_to_ptr.vmem [resolvable:$true] %s345_s22 }
 0x144   :  { %s438_s23 = scalar_lea.vmem %s346_s22, 1024  ;;  %p443_p1 = scmp.lt.s32.totalorder %s346_s22, %s346_s22 }
 0x145   :  { %p439_p0 = scmp.ne.s32.totalorder %s346_s22, %s438_s23  ;;  %p444_p2 = scmp.lt.s32.totalorder %s438_s23, %s438_s23 }
 0x147   :  { %p445_p3 = por %p444_p2, %p443_p1 }
 0x149   :  { %p446_p4 = pnand %p445_p3, %p439_p0 }
 0x1bc   :  { %v66_v22 = vpop.xlane.xlu0 %65 }
 0x1bd   :  { %v67_v23 = vmul.f32 0.0078125, %v66_v22 }
 0x1be   :  { %v70_v24 = vpop.xlane.xlu1 %69 }
 0x1bf   :  { %v72_v25 = vmul.f32 %v67_v23, %v67_v23  ;;  %v71_v26 = vmul.f32 0.0078125, %v70_v24  ;;  %v77_v32 = vsub.f32 %v62_v19, %v67_v23 }
 0x1c1   :  { %v73_v27 = vsub.f32 %v71_v26, %v72_v25 }
 0x1c2   :  { %v87_v35 = vpop.permute.xlu1 %86 }
 0x1c3   :  { %v74_v28 = vadd.f32 1e-05, %v73_v27 }
 0x1c5   :  { %436 = vrsqrt.f32 %v74_v28 }
 0x1cf   :  { %v437_v30 = vpop.eup %436 }
 0x1d0   :  { %v76_v31 = vmul.f32 %v437_v30, %v63_v29 }
 0x1d2   :  { %80 = vperm.xlu0 %429, %v76_v31  }
 0x251   :  { %v81_v33 = vpop.permute.xlu0 %80 }
 0x252   :  { %v83_v34 = vmul.f32 %v81_v33, %v77_v32 }
 0x254   :  { %v89_v36 = vadd.f32 %v87_v35, %v83_v34 }
 0x256   :  { %v547_v37 = vmax.f32 %v89_v36, 0.0 }
 0x258   :  { %114 = vrot.lane.b32.xlu1 %v547_v37, %s463_s6  ;;  %93 = vrot.lane.b32.xlu0 %v547_v37, %s464_s16 }
 0x25c   :  { %134 = vrot.lane.b32.xlu1 %v547_v37, %s465_s17  ;;  %105 = vrot.lane.b32.xlu0 %v547_v37, %s466_s5 }
 0x260   :  { %154 = vrot.lane.b32.xlu1 %v547_v37, %s467_s18  ;;  %125 = vrot.lane.b32.xlu0 %v547_v37, %s468_s19 }
 0x264   :  { %196 = vperm.xlu1 %428, %v186_v38   ;;  %143 = vrot.lane.b32.xlu0 %v547_v37, %s469_s26 }
 0x268   :  { %206 = vperm.xlu1 %428, %v188_v41   ;;  %163 = vrot.lane.b32.xlu0 %v547_v37, %s470_s29 }
 0x26c   :  { %216 = vperm.xlu1 %428, %v190_v42   ;;  %201 = vperm.xlu0 %429, %v187_v43  }
 0x270   :  { %226 = vperm.xlu1 %428, %v192_v44   ;;  %211 = vperm.xlu0 %429, %v189_v45  }
 0x274   :  { %221 = vperm.xlu0 %429, %v191_v46  }
 0x278   :  { %231 = vperm.xlu0 %429, %v193_v47  }
 0x2ca   :  { %v94_v59 = vpop.permute.xlu0 %93  ;;  %v115_v63 = vpop.permute.xlu1 %114 }
 0x2ce   :  { %v106_v3 = vpop.permute.xlu0 %105  ;;  %v135_v9 = vpop.permute.xlu1 %134 }
 0x2cf   :  { %v361_v6 = vpack.c.bf16 %v106_v3, %v94_v59  ;;  %v367_v14 = vpack.c.bf16 %v135_v9, %v547_v37 }
 0x2d1   :  { %388 = vmatprep.subr.msk.bf16.mxu0 %vm360_vm10, %v361_v6  ;;  %406 = vmatprep.subr.msk.bf16.mxu1 %vm360_vm10, %v361_v6 }
 0x2d2   :  { %389 = vmatpush3.bf16.msk.msra.mxu0 %vm360_vm10, %v361_v6  ;;  %411 = vmatpush3.bf16.msk.msra.mxu1 %vm360_vm10, %v361_v6  ;;  %v126_v10 = vpop.permute.xlu0 %125  ;;  %v155_v2 = vpop.permute.xlu1 %154 }
 0x2d3   :  { %v364_v12 = vpack.c.bf16 %v126_v10, %v115_v63 }
 0x2d5   :  { %390 = vmatprep.subr.msk.bf16.mxu0 %vm363_vm15, %v364_v12  ;;  %407 = vmatprep.subr.msk.bf16.mxu1 %vm363_vm15, %v364_v12 }
 0x2d6   :  { %391 = vmatpush3.bf16.msk.msra.mxu0 %vm363_vm15, %v364_v12  ;;  %412 = vmatpush3.bf16.msk.msra.mxu1 %vm363_vm15, %v364_v12  ;;  %v144_v16 = vpop.permute.xlu0 %143 }
 0x2d7   :  { %392 = vmatprep.subr.msk.bf16.mxu0 %vm614_vm2, %v367_v14  ;;  %408 = vmatprep.subr.msk.bf16.mxu1 %vm614_vm2, %v367_v14  ;;  %v370_v17 = vpack.c.bf16 %v155_v2, %v144_v16 }
 0x2da   :  { %393 = vmatpush3.bf16.msk.msra.mxu0 %vm614_vm2, %v367_v14  ;;  %413 = vmatpush3.bf16.msk.msra.mxu1 %vm614_vm2, %v367_v14  ;;  %v164_v18 = vpop.permute.xlu0 %163 }
 0x2db   :  { %394 = vmatprep.subr.msk.bf16.mxu0 %vm369_vm5, %v370_v17  ;;  %409 = vmatprep.subr.msk.bf16.mxu1 %vm369_vm5, %v370_v17  ;;  %v373_v19 = vpack.c.bf16 %v527_v0, %v164_v18 }
 0x2de   :  { %395 = vmatpush3.bf16.msk.msra.mxu0 %vm369_vm5, %v370_v17  ;;  %414 = vmatpush3.bf16.msk.msra.mxu1 %vm369_vm5, %v370_v17 }
 0x2df   :  { %396 = vmatprep.subr.msk.bf16.mxu0 %vm372_vm7, %v373_v19  ;;  %410 = vmatprep.subr.msk.bf16.mxu1 %vm372_vm7, %v373_v19 }
 0x2e2   :  { %397 = vmatpush3.bf16.msk.msra.mxu0 %vm372_vm7, %v373_v19  ;;  %415 = vmatpush3.bf16.msk.msra.mxu1 %vm372_vm7, %v373_v19 }
 0x2e3   :  { %v197_v22 = vpop.permute.xlu1 %196 }
 0x2e5   :  { %399 = vmatmul.mubr.msk.bf16.vlgmr.msra.gmra.mrb[0].mxu0 %vm254_vm0, %v432_v20  ;;  %403 = vmatmul.mubr.msk.bf16.vlgmr.msra.gmra.mrb[0].mxu1 %vm254_vm0, %v433_v21 }
 0x2e7   :  { %v207_v23 = vpop.permute.xlu1 %206 }
 0x2eb   :  { %v202_v0 = vpop.permute.xlu0 %201  ;;  %v217_v25 = vpop.permute.xlu1 %216 }
 0x2ef   :  { %v212_v24 = vpop.permute.xlu0 %211  ;;  %v227_v27 = vpop.permute.xlu1 %226 }
 0x2f3   :  { %v222_v26 = vpop.permute.xlu0 %221 }
 0x2f7   :  { %v232_v28 = vpop.permute.xlu0 %231 }
 0x3b8   :  { %v400_v29 = vpop.f32.mrb[0].mxu0  ;;  %v404_v30 = vpop.f32.mrb[0].mxu1 }
 0x3b9   :  { %v310_v31 = vadd.f32 %v400_v29, %v207_v23  ;;  %v326_v32 = vadd.f32 %v404_v30, %v227_v27  ;;  %v301_v33 = vpop.f32.mrb[1].mxu0  ;;  %v317_v34 = vpop.f32.mrb[1].mxu1 }
 0x3ba   :  { %v302_v35 = vadd.f32 %v301_v33, %v197_v22  ;;  %v318_v36 = vadd.f32 %v317_v34, %v217_v25  ;;  %v401_v37 = vpop.f32.mrb[2].mxu0  ;;  %v405_v38 = vpop.f32.mrb[2].mxu1 }
 0x3bb   :  { %334 = vst [vmem:[#allocation2 + $0x10] sm:$0xff] %v310_v31  ;;  %338 = vst [vmem:[#allocation2 + $0x30] sm:$0xff] %v326_v32  ;;  %v313_v39 = vadd.f32 %v401_v37, %v212_v24  ;;  %v329_v40 = vadd.f32 %v405_v38, %v232_v28  ;;  %v304_v41 = vpop.f32.mrb[3].mxu0  ;;  %v320_v42 = vpop.f32.mrb[3].mxu1 }
 0x3bc   :  { %332 = vst [vmem:[#allocation2] sm:$0xff] %v302_v35  ;;  %336 = vst [vmem:[#allocation2 + $0x20] sm:$0xff] %v318_v36  ;;  %v305_v43 = vadd.f32 %v304_v41, %v202_v0  ;;  %v321_v44 = vadd.f32 %v320_v42, %v222_v26 }
 0x3bd   :  { %335 = vst [vmem:[#allocation2 + $0x18] sm:$0xff] %v313_v39  ;;  %339 = vst [vmem:[#allocation2 + $0x38] sm:$0xff] %v329_v40 }
 0x3be   :  { %333 = vst [vmem:[#allocation2 + $0x8] sm:$0xff] %v305_v43  ;;  %337 = vst [vmem:[#allocation2 + $0x28] sm:$0xff] %v321_v44 }
 0x3bf   :  { %449 = shalt.err (!%p446_p4)
}
 0x3c0   :  { %s450_s26 = scalar_lea.hbm %s659_s9, 1024 }
 0x3c1   :  { %p451_p5 = scmp.ne.s32.totalorder %s659_s9, %s450_s26  ;;  %p454_p6 = scmp.lt.u32.totalorder %s450_s26, %s659_s9 }
 0x3c3   :  { %p456_p7 = pnand %p454_p6, %p451_p5 }
 0x3c5   :  { %459 = shalt.err (!%p456_p7)
}
 0x3c6   :  { %s473_s10 = smov 128  }
 0x3c7   :  { %351 = dma.vmem_to_hbm [thread:$0]  %s346_s22, 1024, %s659_s9, [#allocation3], %s473_s10, %s473_s10, %s466_s5  }
 0x3c8   :  { %460 = dma.done.wait [#allocation3], 1024  }
 0x3c9   :  { %461 = vsyncadd [#allocation3], 4294966272 }
 0x3ca   :  { %355 = vsyncpa [#allocation3], 1 }

</bundles_post_ra>
